<compile_context>
chip_gen: v7x
topology: tpu7x:2x2x1
jax: 0.10.0
libtpu: 0.0.40
codegen_flags: <defaults>
</compile_context>

<pallas_src>
import functools

import jax
import jax.numpy as jnp
from jax.experimental import pallas as pl
from jax.experimental.pallas import tpu as pltpu


def _se_block_kernel(x_ref, w1_ref, w2_ref, o_ref, *, hw):
    """Fused SE block for one batch slab.

    x_ref : (bt, C, HW)  native dtype (f32 / bf16)
    w1_ref: (C, Cr)      fc1 weight, (in x out) layout, f32
    w2_ref: (Cr, C)      fc2 weight, (in x out) layout, f32
    o_ref : (bt, C, HW)  same dtype as x
    """
    # Squeeze: global average pool over the spatial lane axis (f32 accumulate,
    # divide by the true HW).
    y = jnp.sum(x_ref[...].astype(jnp.float32), axis=-1) * (1.0 / hw)     # (bt, C)

    # Excitation: FC -> ReLU -> FC -> sigmoid.  Tiny matmuls (C, Cr << 128);
    # they sit off the slab-DMA critical path, so no MXU-shaped tiling.
    h = jnp.maximum(
        jnp.dot(y, w1_ref[...], preferred_element_type=jnp.float32), 0.0)  # (bt, Cr)
    s = jax.nn.sigmoid(
        jnp.dot(h, w2_ref[...], preferred_element_type=jnp.float32))       # (bt, C)

    # Scale: streaming read -> f32 multiply -> cast back -> store (broadcast
    # channel gates over the lane/spatial axis).
    o_ref[...] = (x_ref[...].astype(jnp.float32) * s[:, :, None]).astype(o_ref.dtype)


@functools.lru_cache(maxsize=1)
def _vmem_capacity_bytes():
    try:
        return int(pltpu.get_tpu_info().vmem_capacity_bytes)
    except Exception:
        return 64 * 1024 * 1024  # conservative default (v7x per-TC VMEM)


@jax.jit
def se_block(x_nchw, w_fc1, w_fc2):
    """x_nchw: (B, C, H, W).  w_fc1: (Cr, C), w_fc2: (C, Cr) (PyTorch Linear layout)."""
    B, C, H, W = x_nchw.shape
    HW = H * W
    Cr = w_fc1.shape[0]
    dtype = x_nchw.dtype
    itemsize = jnp.dtype(dtype).itemsize

    # Lane-dense, unpadded: HW on lanes, full-extent last block dim.
    x3 = x_nchw.reshape(B, C, HW)

    # PyTorch Linear computes y @ W.T -> pass (in, out)-layout weights; pre-cast
    # to f32 once here (tiny) instead of every grid step.
    w1 = jnp.transpose(w_fc1).astype(jnp.float32)    # (C, Cr)
    w2 = jnp.transpose(w_fc2).astype(jnp.float32)    # (Cr, C)
    w_bytes = (C * Cr + Cr * C) * 4

    # Generation-aware slab sizing.  Per grid step the working set is
    # 2x in + 2x out (double-buffered, native dtype) plus one f32 slab temp.
    vmem_cap = _vmem_capacity_bytes()
    if vmem_cap <= 64 * 1024 * 1024:       # v7x: 64 MiB VMEM per TensorCore
        slab_target = 7 * 1024 * 1024      # native-dtype bytes per slab
        vmem_cap_req = 52 * 1024 * 1024    # leave headroom under the 64 MiB cap
    else:                                  # v5e / v6e: 128 MiB VMEM
        slab_target = 14 * 1024 * 1024
        vmem_cap_req = 100 * 1024 * 1024

    row_bytes = C * HW * itemsize
    bt = max(1, min(B, slab_target // max(row_bytes, 1)))
    # Force >= 2 grid steps when B >= 2 so dimension_semantics="parallel" can
    # actually shard the batch across both v7x TensorCores (and the pipeline
    # has more than one step).
    if B >= 2:
        bt = min(bt, (B + 1) // 2)
    grid = (pl.cdiv(B, bt),)   # partial last block: padded rows compute garbage
                               # gates into masked OOB output rows (rows are
                               # independent), so no divisibility loop needed.

    # 2x in + 2x out + f32 temp + double-buffered weights, plus headroom.
    step_ws = 4 * bt * row_bytes + bt * C * HW * 4 + 2 * w_bytes
    vmem_limit = int(min(vmem_cap_req, max(16 * 1024 * 1024, step_ws + (2 << 20))))

    cost = pl.CostEstimate(
        flops=2 * B * C * HW + 4 * B * C * Cr,
        transcendentals=B * C,
        bytes_accessed=2 * B * C * HW * itemsize + w_bytes,
    )

    out3 = pl.pallas_call(
        functools.partial(_se_block_kernel, hw=HW),
        out_shape=jax.ShapeDtypeStruct((B, C, HW), dtype),
        grid=grid,
        in_specs=[
            pl.BlockSpec((bt, C, HW), lambda b: (b, 0, 0)),
            pl.BlockSpec((C, Cr), lambda b: (0, 0)),   # weights stay VMEM-resident
            pl.BlockSpec((Cr, C), lambda b: (0, 0)),
        ],
        out_specs=pl.BlockSpec((bt, C, HW), lambda b: (b, 0, 0)),
        cost_estimate=cost,
        compiler_params=pltpu.CompilerParams(
            dimension_semantics=("parallel",),   # batch slabs are independent
            vmem_limit_bytes=vmem_limit,
        ),
    )(x3, w1, w2)

    return out3.reshape(B, C, H, W)


def se_block_ref(x_nchw, w_fc1, w_fc2):
    """Pure-JAX reference mirroring the PyTorch forward."""
    y = jnp.mean(x_nchw.astype(jnp.float32), axis=(2, 3))      # (B, C)
    y = jnp.maximum(y @ w_fc1.astype(jnp.float32).T, 0.0)      # (B, Cr)
    y = jax.nn.sigmoid(y @ w_fc2.astype(jnp.float32).T)        # (B, C)
    return (x_nchw.astype(jnp.float32) * y[:, :, None, None]).astype(x_nchw.dtype)


if __name__ == "__main__":
    # Module config: in_channels=4, reduction=16 -> reduced = max(4//16, 4) = 4
    # (the tuple-unwrap branch of forward() is host-side control flow; we pass
    # the tensor directly).
    B, C, H, W = 2, 4, 16, 16
    Cr = max(C // 16, 4)

    key = jax.random.PRNGKey(0)
    kx, k1, k2 = jax.random.split(key, 3)
    x = jax.random.normal(kx, (B, C, H, W), dtype=jnp.float32)
    # Deterministic synthetic weights in PyTorch nn.Linear layout (out, in), no bias.
    w_fc1 = jax.random.normal(k1, (Cr, C), dtype=jnp.float32) * 0.1
    w_fc2 = jax.random.normal(k2, (C, Cr), dtype=jnp.float32) * 0.1

    out = se_block(x, w_fc1, w_fc2)
    out = jax.block_until_ready(out)

    ref = se_block_ref(x, w_fc1, w_fc2)
    assert out.shape == (B, C, H, W)
    assert jnp.allclose(out, ref, atol=1e-5, rtol=1e-5), "mismatch vs reference"

    print("KERNEL_OK")
</pallas_src>

<mosaic_0001>
module attributes {stable_mosaic.version = 11 : i64} {
  func.func @_se_block_kernel(%arg0: i32, %arg1: memref<1x4x256xf32, #tpu.memory_space<vmem>>, %arg2: memref<4x4xf32, #tpu.memory_space<vmem>>, %arg3: memref<4x4xf32, #tpu.memory_space<vmem>>, %arg4: memref<1x4x256xf32, #tpu.memory_space<vmem>>) attributes {dimension_semantics = [#tpu.dimension_semantics<parallel>], iteration_bounds = array<i64: 2>, scalar_prefetch = 0 : i64, scratch_operands = 0 : i64, tpu.core_type = #tpu.core_type<tc>, window_params = [{transform_indices = @transform_0, window_bounds = array<i64: 1, 4, 256>}, {pipeline_mode = #tpu.pipeline_mode<synchronous>, transform_indices = @transform_1, window_bounds = array<i64: 4, 4>}, {pipeline_mode = #tpu.pipeline_mode<synchronous>, transform_indices = @transform_2, window_bounds = array<i64: 4, 4>}, {transform_indices = @transform_3, window_bounds = array<i64: 1, 4, 256>}]} {
    %c0 = arith.constant 0 : index
    %c0_0 = arith.constant 0 : index
    %c0_1 = arith.constant 0 : index
    %0 = vector.load %arg1[%c0, %c0_0, %c0_1] : memref<1x4x256xf32, #tpu.memory_space<vmem>>, vector<1x4x256xf32>
    %cst = arith.constant dense<0.000000e+00> : vector<1x4xf32>
    %1 = vector.multi_reduction <add>, %0, %cst [2] : vector<1x4x256xf32> to vector<1x4xf32>
    %cst_2 = arith.constant 3.906250e-03 : f32
    %2 = vector.broadcast %cst_2 : f32 to vector<1x4xf32>
    %3 = arith.mulf %1, %2 : vector<1x4xf32>
    %c0_3 = arith.constant 0 : index
    %c0_4 = arith.constant 0 : index
    %4 = vector.load %arg2[%c0_3, %c0_4] : memref<4x4xf32, #tpu.memory_space<vmem>>, vector<4x4xf32>
    %cst_5 = arith.constant dense<0.000000e+00> : vector<1x4xf32>
    %5 = tpu.matmul %3, %4, %cst_5 {dimension_numbers = #tpu.dot_dimension_numbers<[1], [0], [0], [1], [0, 0, 1, 1], [], []>} : vector<1x4xf32>, vector<4x4xf32>, vector<1x4xf32> -> vector<1x4xf32>
    %cst_6 = arith.constant 0.000000e+00 : f32
    %6 = vector.broadcast %cst_6 : f32 to vector<1x4xf32>
    %7 = arith.maximumf %5, %6 : vector<1x4xf32>
    %c0_7 = arith.constant 0 : index
    %c0_8 = arith.constant 0 : index
    %8 = vector.load %arg3[%c0_7, %c0_8] : memref<4x4xf32, #tpu.memory_space<vmem>>, vector<4x4xf32>
    %cst_9 = arith.constant dense<0.000000e+00> : vector<1x4xf32>
    %9 = tpu.matmul %7, %8, %cst_9 {dimension_numbers = #tpu.dot_dimension_numbers<[1], [0], [0], [1], [0, 0, 1, 1], [], []>} : vector<1x4xf32>, vector<4x4xf32>, vector<1x4xf32> -> vector<1x4xf32>
    %10 = arith.negf %9 : vector<1x4xf32>
    %11 = math.exp %10 : vector<1x4xf32>
    %cst_10 = arith.constant 1.000000e+00 : f32
    %12 = vector.broadcast %cst_10 : f32 to vector<1x4xf32>
    %13 = arith.addf %12, %11 : vector<1x4xf32>
    %14 = arith.divf %12, %13 : vector<1x4xf32>
    %c0_11 = arith.constant 0 : index
    %c0_12 = arith.constant 0 : index
    %c0_13 = arith.constant 0 : index
    %15 = vector.load %arg1[%c0_11, %c0_12, %c0_13] : memref<1x4x256xf32, #tpu.memory_space<vmem>>, vector<1x4x256xf32>
    %16 = vector.shape_cast %14 : vector<1x4xf32> to vector<1x4x1xf32>
    %17 = vector.broadcast %16 : vector<1x4x1xf32> to vector<1x4x256xf32>
    %18 = arith.mulf %15, %17 : vector<1x4x256xf32>
    %c0_14 = arith.constant 0 : index
    %c0_15 = arith.constant 0 : index
    %c0_16 = arith.constant 0 : index
    %19 = vector.load %arg4[%c0_14, %c0_15, %c0_16] : memref<1x4x256xf32, #tpu.memory_space<vmem>>, vector<1x4x256xf32>
    tpu.vector_store %arg4[%c0_14, %c0_15, %c0_16], %18 {strides = array<i32>} : memref<1x4x256xf32, #tpu.memory_space<vmem>>, vector<1x4x256xf32>,
    return
  }
  func.func @transform_0(%arg0: i32) -> (i32, i32, i32) {
    %c0_i32 = arith.constant 0 : i32
    %c0_i32_0 = arith.constant 0 : i32
    %c0_i32_1 = arith.constant 0 : i32
    return %arg0, %c0_i32, %c0_i32_0 : i32, i32, i32
  }
  func.func @transform_1(%arg0: i32) -> (i32, i32) {
    %c0_i32 = arith.constant 0 : i32
    %c0_i32_0 = arith.constant 0 : i32
    %c0_i32_1 = arith.constant 0 : i32
    return %c0_i32, %c0_i32_0 : i32, i32
  }
  func.func @transform_2(%arg0: i32) -> (i32, i32) {
    %c0_i32 = arith.constant 0 : i32
    %c0_i32_0 = arith.constant 0 : i32
    %c0_i32_1 = arith.constant 0 : i32
    return %c0_i32, %c0_i32_0 : i32, i32
  }
  func.func @transform_3(%arg0: i32) -> (i32, i32, i32) {
    %c0_i32 = arith.constant 0 : i32
    %c0_i32_0 = arith.constant 0 : i32
    %c0_i32_1 = arith.constant 0 : i32
    return %arg0, %c0_i32, %c0_i32_0 : i32, i32, i32
  }
}

</mosaic_0001>

<bundles_post_ra>
// kernel: se_block.1
= control target key start
LH: loop header
LB: loop body
LE: loop exit
PB: predicated region body
PF: predicated region fallthrough
CT: control target
= control target key end

     0   :  { %s502_s12 = smov 0   ;;  %s536_s0 = inlined_call_operand.vmem [shape: f32[2,4,256], index: 0, kind: input, shape index: {}]   ;;  %s537_s1 = inlined_call_operand.vmem [shape: f32[4,4], index: 1, kind: input, shape index: {}]   ;;  %s538_s2 = inlined_call_operand.vmem [shape: f32[4,4], index: 2, kind: input, shape index: {}]   ;;  %s539_s3 = inlined_call_operand.vmem [shape: f32[2,4,256], index: 3, kind: output, shape index: {}]  }
   0x1 LB: > { %s423_s13 = sadd.s32 4294967295, %s477_s12   ;;  %p427_p0 = scmp.ge.s32.totalorder %s477_s12, 1  ;;  %s477_s12 = sphi %s502_s12, %s13_s12  }
   0x2   : > { %p137_p1 = scmp.lt.s32.totalorder %s477_s12, 3 }
   0x4   : > { %p138_p2 = pnand %p427_p0, %p137_p1 }
   0x5   : > { %p161_p3 = scmp.lt.s32.totalorder (!%p138_p2), %s423_s13, 1  ;;  %vm175_vm0 = vcmask (!%p138_p2), 1043456   ;;  %v479_v5 = vmov (!%p138_p2), 0.0   ;;  %v182_v6 = vld [vmem:[%s537_s1] sm:$0xf] (!%p138_p2)  ;;  %vm480_vm1 = vmmov (!%p138_p2), 0   ;;  %v184_v7 = vlaneseq (!%p138_p2) }
   0x6   : > { %141 = sbr.rel (%p138_p2) target bundleno = 742 (0x2e6), region = 32  ;;  %445 = vmatprep.subr.mxu0 (!%p138_p2), %v479_v5  ;;  %450 = vmatprep.subr.mxu1 (!%p138_p2), %v479_v5  ;;  %vm190_vm2 = vcmask (!%p138_p2), 31744   ;;  %v267_v14 = vld [vmem:[%s538_s2] sm:$0xf] (!%p138_p2)  ;;  %v481_v26 = vmov (!%p138_p2), 839922192  }
   0x7   : > { %446 = vmatpush3.msk.msra.mxu0 (!%p138_p2), %vm175_vm0, %v182_v6  ;;  %447 = vmatprep.mubr.msk.f32.mxu0 (!%p138_p2), %vm480_vm1, %v479_v5  ;;  %v185_v8 = vand.u32 (!%p138_p2), 127, %v184_v7  ;;  %v187_v9 = vshrl.u32 (!%p138_p2), %v184_v7, 7  ;;  %v359_v27 = vunpack.c.l.s4 (!%p138_p2), %v481_v26 }
   0x8   : > { %452 = vmatprep.mubr.msk.f32.mxu1 (!%p138_p2), %vm480_vm1, %v479_v5  ;;  %451 = vmatpush3.msk.msra.mxu1 (!%p138_p2), %vm175_vm0, %v267_v14 }
   0x9   : > { %v188_v10 = vsub.s32 (!%p138_p2), %v185_v8, %v187_v9  ;;  %v352_v23 = vsub.s32 (!%p138_p2), 0, %v187_v9  ;;  %v360_v28 = vunpack.c.0.s8 (!%p138_p2), %v359_v27 }
   0xb   : > { %v363_v29 = vsub.s32 (!%p138_p2), %v360_v28, %v187_v9 }
   0xd   : > { %s541_s13 = smov (!%p161_p3, %s423_s13), 1 }
   0xe   : > { %s439_s14 = sshll.u32 %s541_s13, 3 }
   0xf   : > { %s165_s17 = scalar_lea.vmem %s536_s0, %s439_s14  ;;  %s170_s24 = scalar_lea.vmem %s539_s3, %s439_s14 }
  0x10   : > { %v171_v0 = vld [vmem:[%s165_s17] sm:$0xff] }
  0x11   : > { %v173_v1 = vcombine.high %v171_v0, %v171_v0  ;;  %v176_v2 = vsel %vm175_vm0, %v171_v0, 0.0 }
  0x13   : > { %v177_v3 = vsel %vm175_vm0, %v173_v1, 0.0 }
  0x14   : > { %v178_v4 = vadd.f32 %v177_v3, %v176_v2 }
  0x16   : > { %179 = vadd.xlane.f32.xlu0 %v178_v4 }
  0xa3   : > { %v180_v11 = vpop.xlane.xlu0 %179 }
  0xa4   : > { %v181_v12 = vmul.f32 0.00390625, %v180_v11 }
  0xa6   : > { %v189_v13 = vrot.slane %v181_v12, %v188_v10 }
  0xa8   : > { %448 = vmatmul.mubr.msk.f32.vlgmr.msra.gmra.mrb[0].mxu0 %vm190_vm2, %v189_v13 }
 0x17b   : > { %v262_v15 = vpop.f32.mrb[0].mxu0 }
 0x17c   : > { %v266_v16 = vmax.f32 %v262_v15, 0.0  ;;  %v449_v17 = vpop.f32.mrb[1].mxu0 }
 0x17e   : > { %453 = vmatmul.mubr.msk.f32.vlgmr.msra.gmra.mrb[0].mxu1 %vm190_vm2, %v266_v16 }
 0x251   : > { %v340_v18 = vpop.f32.mrb[0].mxu1 }
 0x252   : > { %v436_v19 = vmul.f32 -1.442695, %v340_v18  ;;  %v454_v20 = vpop.f32.mrb[1].mxu1 }
 0x254   : > { %467 = vpow2.f32 %v436_v19 }
 0x25e   : > { %v468_v21 = vpop.eup %467 }
 0x25f   : > { %v347_v22 = vadd.f32 1.0, %v468_v21 }
 0x261   : > { %469 = vrcp.f32 %v347_v22 }
 0x26b   : > { %v470_v24 = vpop.eup %469 }
 0x26c   : > { %v353_v25 = vrot.slane %v470_v24, %v352_v23 }
 0x26e   : > { %355 = vbcast.lane.b32.xlu0 %v353_v25, 256 }
 0x2e0   : > { %v356_v30 = vpop.permute.xlu0 %355 }
 0x2e1   : > { %v364_v31 = vrot.slane %v356_v30, %v363_v29 }
 0x2e3   : > { %v366_v32 = vmul.f32 %v364_v31, %v171_v0 }
 0x2e5   : > { %367 = vst [vmem:[%s170_s24] sm:$0xff] %v366_v32 }
 0x2e6 PF: > { %s13_s12 = sadd.s32 1, %s477_s12  }
 0x2e7   : > { %p10_p4 = scmp.ge.s32.totalorder %s13_s12, 4  }
 0x2e9   :  { %12 = sbr.rel (!%p10_p4) target bundleno = 1 (0x1), region = 62 }

</bundles_post_ra>
